<compile_context>
chip_gen: v7x
topology: tpu7x:2x2x1
jax: 0.10.0
libtpu: 0.0.40
codegen_flags: <defaults>
</compile_context>

<pallas_src>
import functools

import jax
import jax.numpy as jnp
from jax import lax
from jax.experimental import pallas as pl
from jax.experimental.pallas import tpu as pltpu

K = 7            # conv kernel size
PAD = K // 2     # conv padding


def _spatial_attention_kernel(x_ref, banded_ref, b_ref, o_ref,
                              acc_max_ref, acc_sum_ref, *, C):
    # x_ref      : (1, Ct, H, W) unpadded input channel-chunk (VMEM)
    # banded_ref : (2, K, W, W)  banded conv weights (VMEM): [0]=max taps, [1]=avg taps
    # b_ref      : (1,)          conv bias (SMEM)
    # o_ref      : (1, 1, H, W)  output block, written only at the last c-step
    # acc_*_ref  : (H, W) f32    running channel max / sum (VMEM scratch)
    Ct = x_ref.shape[1]
    H, W = x_ref.shape[2], x_ref.shape[3]
    c_idx = pl.program_id(1)
    n_c = pl.num_programs(1)

    @pl.when(c_idx == 0)
    def _init():
        acc_max_ref[...] = jnp.full(acc_max_ref.shape, -jnp.inf,
                                    dtype=acc_max_ref.dtype)
        acc_sum_ref[...] = jnp.zeros(acc_sum_ref.shape, dtype=acc_sum_ref.dtype)

    # Fused single-pass channel max + sum over this chunk: each (H, W) plane
    # is read from VMEM exactly once and feeds both accumulators.
    x0 = x_ref[0, 0].astype(jnp.float32)
    cmax = x0
    csum = x0
    for cc in range(1, Ct):
        xc = x_ref[0, cc].astype(jnp.float32)
        cmax = jnp.maximum(cmax, xc)
        csum = csum + xc

    acc_max_ref[...] = jnp.maximum(acc_max_ref[...], cmax)
    acc_sum_ref[...] = acc_sum_ref[...] + csum

    @pl.when(c_idx == n_c - 1)
    def _finalize():
        # Zero-pad only along H (sublane); the W-direction zero padding is
        # already folded into the banded weight matrices.
        zrows = jnp.zeros((PAD, W), jnp.float32)
        max_p = jnp.concatenate(
            [zrows, acc_max_ref[...], zrows], axis=0)                 # (H+2*PAD, W)
        avg_p = jnp.concatenate(
            [zrows, acc_sum_ref[...] * (1.0 / C), zrows], axis=0)     # (H+2*PAD, W)

        # 7x7 conv as 7 banded MXU matmuls per map; two independent partial
        # accumulators (max path / avg path) give the scheduler ILP.
        acc_m = jnp.zeros((H, W), jnp.float32)
        acc_a = jnp.zeros((H, W), jnp.float32)
        for ky in range(K):
            acc_m = acc_m + jnp.dot(max_p[ky:ky + H, :], banded_ref[0, ky],
                                    preferred_element_type=jnp.float32)
            acc_a = acc_a + jnp.dot(avg_p[ky:ky + H, :], banded_ref[1, ky],
                                    preferred_element_type=jnp.float32)

        o_ref[0, 0] = jax.nn.sigmoid(acc_m + acc_a + b_ref[0]).astype(o_ref.dtype)


def _pick_channel_chunk(C, H, W, itemsize, budget_bytes=8 << 20):
    """Largest divisor of C whose double-buffered (1,Ct,H,W) block fits budget."""
    per_ch = 2 * H * W * itemsize          # x2 for double-buffering
    max_ct = max(1, budget_bytes // per_ch)
    ct = 1
    for d in range(1, C + 1):
        if C % d == 0 and d <= max_ct:
            ct = d
    return ct


def _banded_conv_weights(conv_w, W):
    """(1,2,K,K) conv weights -> (2,K,W,W) banded matrices that fold the kx
    taps and the W-direction zero padding: B[c,ky,j,w] = w[c,ky,j-w+PAD]."""
    wk = conv_w.astype(jnp.float32).reshape(2, K, K)
    j = jnp.arange(W)[:, None]             # source column
    w = jnp.arange(W)[None, :]             # output column
    d = j - w + PAD                        # tap index kx
    valid = (d >= 0) & (d < K)
    d_c = jnp.clip(d, 0, K - 1)
    return jnp.where(valid[None, None, :, :], wk[:, :, d_c], 0.0)   # (2,K,W,W)


def spatial_attention(x, conv_w, conv_b, *, channel_chunk=None):
    """x: (N,C,H,W); conv_w: (1,2,K,K); conv_b: (1,). Returns (N,1,H,W) f32."""
    N, C, H, W = x.shape
    itemsize = jnp.dtype(x.dtype).itemsize

    ct = channel_chunk or _pick_channel_chunk(C, H, W, itemsize)
    assert C % ct == 0, (C, ct)
    num_c = C // ct

    banded = _banded_conv_weights(conv_w, W)            # (2, K, W, W) f32
    b_flat = conv_b.astype(jnp.float32).reshape(1)      # (1,)

    # Explicit VMEM budget: double-buffered x chunk + banded weights + output
    # block + the two (H, W) scratch accumulators, plus headroom. Capped at
    # 48 MiB so it always fits v7x's 64 MiB physical VMEM.
    est = (2 * ct * H * W * itemsize     # x chunk, double-buffered
           + 2 * 2 * K * W * W * 4       # banded weights
           + 2 * H * W * 4               # output block
           + 2 * H * W * 4               # scratch accumulators
           + (2 << 20))                  # headroom
    vmem_limit = int(min(max(est, 4 << 20), 48 << 20))

    kernel = functools.partial(_spatial_attention_kernel, C=C)

    return pl.pallas_call(
        kernel,
        out_shape=jax.ShapeDtypeStruct((N, 1, H, W), jnp.float32),
        grid=(N, num_c),
        in_specs=[
            pl.BlockSpec((1, ct, H, W), lambda n, c: (n, c, 0, 0)),
            pl.BlockSpec((2, K, W, W), lambda n, c: (0, 0, 0, 0)),
            pl.BlockSpec(memory_space=pltpu.MemorySpace.SMEM),
        ],
        out_specs=pl.BlockSpec((1, 1, H, W), lambda n, c: (n, 0, 0, 0)),
        scratch_shapes=[
            pltpu.VMEM((H, W), jnp.float32),   # running channel max
            pltpu.VMEM((H, W), jnp.float32),   # running channel sum
        ],
        compiler_params=pltpu.CompilerParams(
            dimension_semantics=("parallel", "arbitrary"),
            vmem_limit_bytes=vmem_limit,
        ),
    )(x, banded, b_flat)


def _reference(x, conv_w, conv_b):
    """Pure-JAX reference matching the PyTorch forward."""
    max_map = jnp.max(x, axis=1, keepdims=True)
    avg_map = jnp.mean(x, axis=1, keepdims=True)
    r = jnp.concatenate([max_map, avg_map], axis=1)          # (N, 2, H, W)
    out = lax.conv_general_dilated(
        r, conv_w, window_strides=(1, 1),
        padding=[(PAD, PAD), (PAD, PAD)],
        dimension_numbers=("NCHW", "OIHW", "NCHW"),
    ) + conv_b.reshape(1, 1, 1, 1)
    return jax.nn.sigmoid(out)


if __name__ == "__main__":
    key = jax.random.PRNGKey(0)
    kx, kw, kb = jax.random.split(key, 3)

    N, C, H, W = 2, 4, 16, 16
    x = jax.random.normal(kx, (N, C, H, W), dtype=jnp.float32)

    # Deterministic parameter init (shapes match nn.Conv2d(2, 1, 7, padding=3)).
    fan_in = 2 * K * K
    bound = 1.0 / (fan_in ** 0.5)
    conv_w = jax.random.uniform(kw, (1, 2, K, K), jnp.float32, -bound, bound)
    conv_b = jax.random.uniform(kb, (1,), jnp.float32, -bound, bound)

    out = spatial_attention(x, conv_w, conv_b)
    out = jax.block_until_ready(out)

    ref = _reference(x, conv_w, conv_b)
    assert out.shape == (N, 1, H, W), out.shape
    # The conv now runs on the MXU; f32 matmuls may round intermediates, so
    # compare against the XLA conv reference with a small tolerance.
    assert jnp.allclose(out, ref, atol=2e-3, rtol=2e-3), \
        float(jnp.max(jnp.abs(out - ref)))

    print("KERNEL_OK")
</pallas_src>

<mosaic_0001>
module attributes {stable_mosaic.version = 11 : i64} {
  func.func @_spatial_attention_kernel(%arg0: i32, %arg1: i32, %arg2: memref<1x4x16x16xf32, #tpu.memory_space<vmem>>, %arg3: memref<2x7x16x16xf32, #tpu.memory_space<vmem>>, %arg4: memref<1xf32, #tpu.memory_space<smem>>, %arg5: memref<1x1x16x16xf32, #tpu.memory_space<vmem>>, %arg6: memref<16x16xf32, #tpu.memory_space<vmem>>, %arg7: memref<16x16xf32, #tpu.memory_space<vmem>>) attributes {dimension_semantics = [#tpu.dimension_semantics<parallel>, #tpu.dimension_semantics<arbitrary>], iteration_bounds = array<i64: 2, 1>, scalar_prefetch = 0 : i64, scratch_operands = 2 : i64, tpu.core_type = #tpu.core_type<tc>, window_params = [{transform_indices = @transform_0, window_bounds = array<i64: 1, 4, 16, 16>}, {pipeline_mode = #tpu.pipeline_mode<synchronous>, transform_indices = @transform_1, window_bounds = array<i64: 2, 7, 16, 16>}, {transform_indices = @transform_2, window_bounds = array<i64: 1>}, {transform_indices = @transform_3, window_bounds = array<i64: 1, 1, 16, 16>}]} {
    %c0_i32 = arith.constant 0 : i32
    %0 = arith.cmpi eq, %arg1, %c0_i32 : i32
    %1 = arith.extui %0 : i1 to i32
    %c0_i32_0 = arith.constant 0 : i32
    %2 = arith.cmpi ne, %1, %c0_i32_0 : i32
    scf.if %2 {
      %cst = arith.constant 0xFF800000 : f32
      %26 = vector.broadcast %cst : f32 to vector<16x16xf32>
      %c0_23 = arith.constant 0 : index
      %c0_24 = arith.constant 0 : index
      %27 = vector.load %arg6[%c0_23, %c0_24] : memref<16x16xf32, #tpu.memory_space<vmem>>, vector<16x16xf32>
      tpu.vector_store %arg6[%c0_23, %c0_24], %26 {strides = array<i32>} : memref<16x16xf32, #tpu.memory_space<vmem>>, vector<16x16xf32>,
      %cst_25 = arith.constant 0.000000e+00 : f32
      %28 = vector.broadcast %cst_25 : f32 to vector<16x16xf32>
      %c0_26 = arith.constant 0 : index
      %c0_27 = arith.constant 0 : index
      %29 = vector.load %arg7[%c0_26, %c0_27] : memref<16x16xf32, #tpu.memory_space<vmem>>, vector<16x16xf32>
      tpu.vector_store %arg7[%c0_26, %c0_27], %28 {strides = array<i32>} : memref<16x16xf32, #tpu.memory_space<vmem>>, vector<16x16xf32>,
    } else {
    }
    %c0 = arith.constant 0 : index
    %c0_1 = arith.constant 0 : index
    %c0_2 = arith.constant 0 : index
    %c0_3 = arith.constant 0 : index
    %3 = vector.load %arg2[%c0, %c0_1, %c0_2, %c0_3] : memref<1x4x16x16xf32, #tpu.memory_space<vmem>>, vector<1x1x16x16xf32>
    %4 = vector.shape_cast %3 : vector<1x1x16x16xf32> to vector<16x16xf32>
    %c0_4 = arith.constant 0 : index
    %c1 = arith.constant 1 : index
    %c0_5 = arith.constant 0 : index
    %c0_6 = arith.constant 0 : index
    %5 = vector.load %arg2[%c0_4, %c1, %c0_5, %c0_6] : memref<1x4x16x16xf32, #tpu.memory_space<vmem>>, vector<1x1x16x16xf32>
    %6 = vector.shape_cast %5 : vector<1x1x16x16xf32> to vector<16x16xf32>
    %7 = arith.maximumf %4, %6 : vector<16x16xf32>
    %8 = arith.addf %4, %6 : vector<16x16xf32>
    %c0_7 = arith.constant 0 : index
    %c2 = arith.constant 2 : index
    %c0_8 = arith.constant 0 : index
    %c0_9 = arith.constant 0 : index
    %9 = vector.load %arg2[%c0_7, %c2, %c0_8, %c0_9] : memref<1x4x16x16xf32, #tpu.memory_space<vmem>>, vector<1x1x16x16xf32>
    %10 = vector.shape_cast %9 : vector<1x1x16x16xf32> to vector<16x16xf32>
    %11 = arith.maximumf %7, %10 : vector<16x16xf32>
    %12 = arith.addf %8, %10 : vector<16x16xf32>
    %c0_10 = arith.constant 0 : index
    %c3 = arith.constant 3 : index
    %c0_11 = arith.constant 0 : index
    %c0_12 = arith.constant 0 : index
    %13 = vector.load %arg2[%c0_10, %c3, %c0_11, %c0_12] : memref<1x4x16x16xf32, #tpu.memory_space<vmem>>, vector<1x1x16x16xf32>
    %14 = vector.shape_cast %13 : vector<1x1x16x16xf32> to vector<16x16xf32>
    %15 = arith.maximumf %11, %14 : vector<16x16xf32>
    %16 = arith.addf %12, %14 : vector<16x16xf32>
    %c0_13 = arith.constant 0 : index
    %c0_14 = arith.constant 0 : index
    %17 = vector.load %arg6[%c0_13, %c0_14] : memref<16x16xf32, #tpu.memory_space<vmem>>, vector<16x16xf32>
    %18 = arith.maximumf %17, %15 : vector<16x16xf32>
    %c0_15 = arith.constant 0 : index
    %c0_16 = arith.constant 0 : index
    %19 = vector.load %arg6[%c0_15, %c0_16] : memref<16x16xf32, #tpu.memory_space<vmem>>, vector<16x16xf32>
    tpu.vector_store %arg6[%c0_15, %c0_16], %18 {strides = array<i32>} : memref<16x16xf32, #tpu.memory_space<vmem>>, vector<16x16xf32>,
    %c0_17 = arith.constant 0 : index
    %c0_18 = arith.constant 0 : index
    %20 = vector.load %arg7[%c0_17, %c0_18] : memref<16x16xf32, #tpu.memory_space<vmem>>, vector<16x16xf32>
    %21 = arith.addf %20, %16 : vector<16x16xf32>
    %c0_19 = arith.constant 0 : index
    %c0_20 = arith.constant 0 : index
    %22 = vector.load %arg7[%c0_19, %c0_20] : memref<16x16xf32, #tpu.memory_space<vmem>>, vector<16x16xf32>
    tpu.vector_store %arg7[%c0_19, %c0_20], %21 {strides = array<i32>} : memref<16x16xf32, #tpu.memory_space<vmem>>, vector<16x16xf32>,
    %c0_i32_21 = arith.constant 0 : i32
    %23 = arith.cmpi eq, %arg1, %c0_i32_21 : i32
    %24 = arith.extui %23 : i1 to i32
    %c0_i32_22 = arith.constant 0 : i32
    %25 = arith.cmpi ne, %24, %c0_i32_22 : i32
    scf.if %25 {
      %cst = arith.constant 0.000000e+00 : f32
      %26 = vector.broadcast %cst : f32 to vector<3x16xf32>
      %c0_23 = arith.constant 0 : index
      %c0_24 = arith.constant 0 : index
      %27 = vector.load %arg6[%c0_23, %c0_24] : memref<16x16xf32, #tpu.memory_space<vmem>>, vector<16x16xf32>
      %28 = tpu.concatenate %26, %27, %26 in 0 : vector<3x16xf32>, vector<16x16xf32>, vector<3x16xf32> -> vector<22x16xf32>
      %c0_25 = arith.constant 0 : index
      %c0_26 = arith.constant 0 : index
      %29 = vector.load %arg7[%c0_25, %c0_26] : memref<16x16xf32, #tpu.memory_space<vmem>>, vector<16x16xf32>
      %cst_27 = arith.constant 2.500000e-01 : f32
      %30 = vector.broadcast %cst_27 : f32 to vector<16x16xf32>
      %31 = arith.mulf %29, %30 : vector<16x16xf32>
      %32 = tpu.concatenate %26, %31, %26 in 0 : vector<3x16xf32>, vector<16x16xf32>, vector<3x16xf32> -> vector<22x16xf32>
      %cst_28 = arith.constant 0.000000e+00 : f32
      %33 = vector.broadcast %cst_28 : f32 to vector<16x16xf32>
      %cst_29 = arith.constant 0.000000e+00 : f32
      %34 = vector.broadcast %cst_29 : f32 to vector<16x16xf32>
      %35 = vector.extract_strided_slice %28 {offsets = [0, 0], sizes = [16, 16], strides = [1, 1]} : vector<22x16xf32> to vector<16x16xf32>
      %c0_30 = arith.constant 0 : index
      %c0_31 = arith.constant 0 : index
      %c0_32 = arith.constant 0 : index
      %c0_33 = arith.constant 0 : index
      %36 = vector.load %arg3[%c0_30, %c0_31, %c0_32, %c0_33] : memref<2x7x16x16xf32, #tpu.memory_space<vmem>>, vector<1x1x16x16xf32>
      %37 = vector.shape_cast %36 : vector<1x1x16x16xf32> to vector<16x16xf32>
      %cst_34 = arith.constant dense<0.000000e+00> : vector<16x16xf32>
      %38 = tpu.matmul %35, %37, %cst_34 {dimension_numbers = #tpu.dot_dimension_numbers<[1], [0], [0], [1], [0, 0, 1, 1], [], []>} : vector<16x16xf32>, vector<16x16xf32>, vector<16x16xf32> -> vector<16x16xf32>
      %39 = arith.addf %33, %38 : vector<16x16xf32>
      %40 = vector.extract_strided_slice %32 {offsets = [0, 0], sizes = [16, 16], strides = [1, 1]} : vector<22x16xf32> to vector<16x16xf32>
      %c1_35 = arith.constant 1 : index
      %c0_36 = arith.constant 0 : index
      %c0_37 = arith.constant 0 : index
      %c0_38 = arith.constant 0 : index
      %41 = vector.load %arg3[%c1_35, %c0_36, %c0_37, %c0_38] : memref<2x7x16x16xf32, #tpu.memory_space<vmem>>, vector<1x1x16x16xf32>
      %42 = vector.shape_cast %41 : vector<1x1x16x16xf32> to vector<16x16xf32>
      %cst_39 = arith.constant dense<0.000000e+00> : vector<16x16xf32>
      %43 = tpu.matmul %40, %42, %cst_39 {dimension_numbers = #tpu.dot_dimension_numbers<[1], [0], [0], [1], [0, 0, 1, 1], [], []>} : vector<16x16xf32>, vector<16x16xf32>, vector<16x16xf32> -> vector<16x16xf32>
      %44 = arith.addf %34, %43 : vector<16x16xf32>
      %45 = vector.extract_strided_slice %28 {offsets = [1, 0], sizes = [16, 16], strides = [1, 1]} : vector<22x16xf32> to vector<16x16xf32>
      %c0_40 = arith.constant 0 : index
      %c1_41 = arith.constant 1 : index
      %c0_42 = arith.constant 0 : index
      %c0_43 = arith.constant 0 : index
      %46 = vector.load %arg3[%c0_40, %c1_41, %c0_42, %c0_43] : memref<2x7x16x16xf32, #tpu.memory_space<vmem>>, vector<1x1x16x16xf32>
      %47 = vector.shape_cast %46 : vector<1x1x16x16xf32> to vector<16x16xf32>
      %cst_44 = arith.constant dense<0.000000e+00> : vector<16x16xf32>
      %48 = tpu.matmul %45, %47, %cst_44 {dimension_numbers = #tpu.dot_dimension_numbers<[1], [0], [0], [1], [0, 0, 1, 1], [], []>} : vector<16x16xf32>, vector<16x16xf32>, vector<16x16xf32> -> vector<16x16xf32>
      %49 = arith.addf %39, %48 : vector<16x16xf32>
      %50 = vector.extract_strided_slice %32 {offsets = [1, 0], sizes = [16, 16], strides = [1, 1]} : vector<22x16xf32> to vector<16x16xf32>
      %c1_45 = arith.constant 1 : index
      %c1_46 = arith.constant 1 : index
      %c0_47 = arith.constant 0 : index
      %c0_48 = arith.constant 0 : index
      %51 = vector.load %arg3[%c1_45, %c1_46, %c0_47, %c0_48] : memref<2x7x16x16xf32, #tpu.memory_space<vmem>>, vector<1x1x16x16xf32>
      %52 = vector.shape_cast %51 : vector<1x1x16x16xf32> to vector<16x16xf32>
      %cst_49 = arith.constant dense<0.000000e+00> : vector<16x16xf32>
      %53 = tpu.matmul %50, %52, %cst_49 {dimension_numbers = #tpu.dot_dimension_numbers<[1], [0], [0], [1], [0, 0, 1, 1], [], []>} : vector<16x16xf32>, vector<16x16xf32>, vector<16x16xf32> -> vector<16x16xf32>
      %54 = arith.addf %44, %53 : vector<16x16xf32>
      %55 = vector.extract_strided_slice %28 {offsets = [2, 0], sizes = [16, 16], strides = [1, 1]} : vector<22x16xf32> to vector<16x16xf32>
      %c0_50 = arith.constant 0 : index
      %c2_51 = arith.constant 2 : index
      %c0_52 = arith.constant 0 : index
      %c0_53 = arith.constant 0 : index
      %56 = vector.load %arg3[%c0_50, %c2_51, %c0_52, %c0_53] : memref<2x7x16x16xf32, #tpu.memory_space<vmem>>, vector<1x1x16x16xf32>
      %57 = vector.shape_cast %56 : vector<1x1x16x16xf32> to vector<16x16xf32>
      %cst_54 = arith.constant dense<0.000000e+00> : vector<16x16xf32>
      %58 = tpu.matmul %55, %57, %cst_54 {dimension_numbers = #tpu.dot_dimension_numbers<[1], [0], [0], [1], [0, 0, 1, 1], [], []>} : vector<16x16xf32>, vector<16x16xf32>, vector<16x16xf32> -> vector<16x16xf32>
      %59 = arith.addf %49, %58 : vector<16x16xf32>
      %60 = vector.extract_strided_slice %32 {offsets = [2, 0], sizes = [16, 16], strides = [1, 1]} : vector<22x16xf32> to vector<16x16xf32>
      %c1_55 = arith.constant 1 : index
      %c2_56 = arith.constant 2 : index
      %c0_57 = arith.constant 0 : index
      %c0_58 = arith.constant 0 : index
      %61 = vector.load %arg3[%c1_55, %c2_56, %c0_57, %c0_58] : memref<2x7x16x16xf32, #tpu.memory_space<vmem>>, vector<1x1x16x16xf32>
      %62 = vector.shape_cast %61 : vector<1x1x16x16xf32> to vector<16x16xf32>
      %cst_59 = arith.constant dense<0.000000e+00> : vector<16x16xf32>
      %63 = tpu.matmul %60, %62, %cst_59 {dimension_numbers = #tpu.dot_dimension_numbers<[1], [0], [0], [1], [0, 0, 1, 1], [], []>} : vector<16x16xf32>, vector<16x16xf32>, vector<16x16xf32> -> vector<16x16xf32>
      %64 = arith.addf %54, %63 : vector<16x16xf32>
      %65 = vector.extract_strided_slice %28 {offsets = [3, 0], sizes = [16, 16], strides = [1, 1]} : vector<22x16xf32> to vector<16x16xf32>
      %c0_60 = arith.constant 0 : index
      %c3_61 = arith.constant 3 : index
      %c0_62 = arith.constant 0 : index
      %c0_63 = arith.constant 0 : index
      %66 = vector.load %arg3[%c0_60, %c3_61, %c0_62, %c0_63] : memref<2x7x16x16xf32, #tpu.memory_space<vmem>>, vector<1x1x16x16xf32>
      %67 = vector.shape_cast %66 : vector<1x1x16x16xf32> to vector<16x16xf32>
      %cst_64 = arith.constant dense<0.000000e+00> : vector<16x16xf32>
      %68 = tpu.matmul %65, %67, %cst_64 {dimension_numbers = #tpu.dot_dimension_numbers<[1], [0], [0], [1], [0, 0, 1, 1], [], []>} : vector<16x16xf32>, vector<16x16xf32>, vector<16x16xf32> -> vector<16x16xf32>
      %69 = arith.addf %59, %68 : vector<16x16xf32>
      %70 = vector.extract_strided_slice %32 {offsets = [3, 0], sizes = [16, 16], strides = [1, 1]} : vector<22x16xf32> to vector<16x16xf32>
      %c1_65 = arith.constant 1 : index
      %c3_66 = arith.constant 3 : index
      %c0_67 = arith.constant 0 : index
      %c0_68 = arith.constant 0 : index
      %71 = vector.load %arg3[%c1_65, %c3_66, %c0_67, %c0_68] : memref<2x7x16x16xf32, #tpu.memory_space<vmem>>, vector<1x1x16x16xf32>
      %72 = vector.shape_cast %71 : vector<1x1x16x16xf32> to vector<16x16xf32>
      %cst_69 = arith.constant dense<0.000000e+00> : vector<16x16xf32>
      %73 = tpu.matmul %70, %72, %cst_69 {dimension_numbers = #tpu.dot_dimension_numbers<[1], [0], [0], [1], [0, 0, 1, 1], [], []>} : vector<16x16xf32>, vector<16x16xf32>, vector<16x16xf32> -> vector<16x16xf32>
      %74 = arith.addf %64, %73 : vector<16x16xf32>
      %75 = vector.extract_strided_slice %28 {offsets = [4, 0], sizes = [16, 16], strides = [1, 1]} : vector<22x16xf32> to vector<16x16xf32>
      %c0_70 = arith.constant 0 : index
      %c4 = arith.constant 4 : index
      %c0_71 = arith.constant 0 : index
      %c0_72 = arith.constant 0 : index
      %76 = vector.load %arg3[%c0_70, %c4, %c0_71, %c0_72] : memref<2x7x16x16xf32, #tpu.memory_space<vmem>>, vector<1x1x16x16xf32>
      %77 = vector.shape_cast %76 : vector<1x1x16x16xf32> to vector<16x16xf32>
      %cst_73 = arith.constant dense<0.000000e+00> : vector<16x16xf32>
      %78 = tpu.matmul %75, %77, %cst_73 {dimension_numbers = #tpu.dot_dimension_numbers<[1], [0], [0], [1], [0, 0, 1, 1], [], []>} : vector<16x16xf32>, vector<16x16xf32>, vector<16x16xf32> -> vector<16x16xf32>
      %79 = arith.addf %69, %78 : vector<16x16xf32>
      %80 = vector.extract_strided_slice %32 {offsets = [4, 0], sizes = [16, 16], strides = [1, 1]} : vector<22x16xf32> to vector<16x16xf32>
      %c1_74 = arith.constant 1 : index
      %c4_75 = arith.constant 4 : index
      %c0_76 = arith.constant 0 : index
      %c0_77 = arith.constant 0 : index
      %81 = vector.load %arg3[%c1_74, %c4_75, %c0_76, %c0_77] : memref<2x7x16x16xf32, #tpu.memory_space<vmem>>, vector<1x1x16x16xf32>
      %82 = vector.shape_cast %81 : vector<1x1x16x16xf32> to vector<16x16xf32>
      %cst_78 = arith.constant dense<0.000000e+00> : vector<16x16xf32>
      %83 = tpu.matmul %80, %82, %cst_78 {dimension_numbers = #tpu.dot_dimension_numbers<[1], [0], [0], [1], [0, 0, 1, 1], [], []>} : vector<16x16xf32>, vector<16x16xf32>, vector<16x16xf32> -> vector<16x16xf32>
      %84 = arith.addf %74, %83 : vector<16x16xf32>
      %85 = vector.extract_strided_slice %28 {offsets = [5, 0], sizes = [16, 16], strides = [1, 1]} : vector<22x16xf32> to vector<16x16xf32>
      %c0_79 = arith.constant 0 : index
      %c5 = arith.constant 5 : index
      %c0_80 = arith.constant 0 : index
      %c0_81 = arith.constant 0 : index
      %86 = vector.load %arg3[%c0_79, %c5, %c0_80, %c0_81] : memref<2x7x16x16xf32, #tpu.memory_space<vmem>>, vector<1x1x16x16xf32>
      %87 = vector.shape_cast %86 : vector<1x1x16x16xf32> to vector<16x16xf32>
      %cst_82 = arith.constant dense<0.000000e+00> : vector<16x16xf32>
      %88 = tpu.matmul %85, %87, %cst_82 {dimension_numbers = #tpu.dot_dimension_numbers<[1], [0], [0], [1], [0, 0, 1, 1], [], []>} : vector<16x16xf32>, vector<16x16xf32>, vector<16x16xf32> -> vector<16x16xf32>
      %89 = arith.addf %79, %88 : vector<16x16xf32>
      %90 = vector.extract_strided_slice %32 {offsets = [5, 0], sizes = [16, 16], strides = [1, 1]} : vector<22x16xf32> to vector<16x16xf32>
      %c1_83 = arith.constant 1 : index
      %c5_84 = arith.constant 5 : index
      %c0_85 = arith.constant 0 : index
      %c0_86 = arith.constant 0 : index
      %91 = vector.load %arg3[%c1_83, %c5_84, %c0_85, %c0_86] : memref<2x7x16x16xf32, #tpu.memory_space<vmem>>, vector<1x1x16x16xf32>
      %92 = vector.shape_cast %91 : vector<1x1x16x16xf32> to vector<16x16xf32>
      %cst_87 = arith.constant dense<0.000000e+00> : vector<16x16xf32>
      %93 = tpu.matmul %90, %92, %cst_87 {dimension_numbers = #tpu.dot_dimension_numbers<[1], [0], [0], [1], [0, 0, 1, 1], [], []>} : vector<16x16xf32>, vector<16x16xf32>, vector<16x16xf32> -> vector<16x16xf32>
      %94 = arith.addf %84, %93 : vector<16x16xf32>
      %95 = vector.extract_strided_slice %28 {offsets = [6, 0], sizes = [16, 16], strides = [1, 1]} : vector<22x16xf32> to vector<16x16xf32>
      %c0_88 = arith.constant 0 : index
      %c6 = arith.constant 6 : index
      %c0_89 = arith.constant 0 : index
      %c0_90 = arith.constant 0 : index
      %96 = vector.load %arg3[%c0_88, %c6, %c0_89, %c0_90] : memref<2x7x16x16xf32, #tpu.memory_space<vmem>>, vector<1x1x16x16xf32>
      %97 = vector.shape_cast %96 : vector<1x1x16x16xf32> to vector<16x16xf32>
      %cst_91 = arith.constant dense<0.000000e+00> : vector<16x16xf32>
      %98 = tpu.matmul %95, %97, %cst_91 {dimension_numbers = #tpu.dot_dimension_numbers<[1], [0], [0], [1], [0, 0, 1, 1], [], []>} : vector<16x16xf32>, vector<16x16xf32>, vector<16x16xf32> -> vector<16x16xf32>
      %99 = arith.addf %89, %98 : vector<16x16xf32>
      %100 = vector.extract_strided_slice %32 {offsets = [6, 0], sizes = [16, 16], strides = [1, 1]} : vector<22x16xf32> to vector<16x16xf32>
      %c1_92 = arith.constant 1 : index
      %c6_93 = arith.constant 6 : index
      %c0_94 = arith.constant 0 : index
      %c0_95 = arith.constant 0 : index
      %101 = vector.load %arg3[%c1_92, %c6_93, %c0_94, %c0_95] : memref<2x7x16x16xf32, #tpu.memory_space<vmem>>, vector<1x1x16x16xf32>
      %102 = vector.shape_cast %101 : vector<1x1x16x16xf32> to vector<16x16xf32>
      %cst_96 = arith.constant dense<0.000000e+00> : vector<16x16xf32>
      %103 = tpu.matmul %100, %102, %cst_96 {dimension_numbers = #tpu.dot_dimension_numbers<[1], [0], [0], [1], [0, 0, 1, 1], [], []>} : vector<16x16xf32>, vector<16x16xf32>, vector<16x16xf32> -> vector<16x16xf32>
      %104 = arith.addf %94, %103 : vector<16x16xf32>
      %105 = arith.addf %99, %104 : vector<16x16xf32>
      %c0_97 = arith.constant 0 : index
      %106 = memref.load %arg4[%c0_97] : memref<1xf32, #tpu.memory_space<smem>>
      %107 = vector.broadcast %106 : f32 to vector<16x16xf32>
      %108 = arith.addf %105, %107 : vector<16x16xf32>
      %109 = arith.negf %108 : vector<16x16xf32>
      %110 = math.exp %109 : vector<16x16xf32>
      %cst_98 = arith.constant 1.000000e+00 : f32
      %111 = vector.broadcast %cst_98 : f32 to vector<16x16xf32>
      %112 = arith.addf %111, %110 : vector<16x16xf32>
      %113 = arith.divf %111, %112 : vector<16x16xf32>
      %c0_99 = arith.constant 0 : index
      %c0_100 = arith.constant 0 : index
      %c0_101 = arith.constant 0 : index
      %c0_102 = arith.constant 0 : index
      %114 = vector.load %arg5[%c0_99, %c0_100, %c0_101, %c0_102] : memref<1x1x16x16xf32, #tpu.memory_space<vmem>>, vector<1x1x16x16xf32>
      %115 = vector.shape_cast %114 : vector<1x1x16x16xf32> to vector<16x16xf32>
      %116 = vector.shape_cast %113 : vector<16x16xf32> to vector<1x1x16x16xf32>
      tpu.vector_store %arg5[%c0_99, %c0_100, %c0_101, %c0_102], %116 {strides = array<i32>} : memref<1x1x16x16xf32, #tpu.memory_space<vmem>>, vector<1x1x16x16xf32>,
    } else {
    }
    return
  }
  func.func @transform_0(%arg0: i32, %arg1: i32) -> (i32, i32, i32, i32) {
    %c0_i32 = arith.constant 0 : i32
    %c0_i32_0 = arith.constant 0 : i32
    %c0_i32_1 = arith.constant 0 : i32
    return %arg0, %arg1, %c0_i32, %c0_i32_0 : i32, i32, i32, i32
  }
  func.func @transform_1(%arg0: i32, %arg1: i32) -> (i32, i32, i32, i32) {
    %c0_i32 = arith.constant 0 : i32
    %c0_i32_0 = arith.constant 0 : i32
    %c0_i32_1 = arith.constant 0 : i32
    %c0_i32_2 = arith.constant 0 : i32
    %c0_i32_3 = arith.constant 0 : i32
    return %c0_i32, %c0_i32_0, %c0_i32_1, %c0_i32_2 : i32, i32, i32, i32
  }
  func.func @transform_2(%arg0: i32, %arg1: i32) -> i32 {
    %c0_i32 = arith.constant 0 : i32
    %c0_i32_0 = arith.constant 0 : i32
    return %c0_i32 : i32
  }
  func.func @transform_3(%arg0: i32, %arg1: i32) -> (i32, i32, i32, i32) {
    %c0_i32 = arith.constant 0 : i32
    %c0_i32_0 = arith.constant 0 : i32
    %c0_i32_1 = arith.constant 0 : i32
    %c0_i32_2 = arith.constant 0 : i32
    return %arg0, %c0_i32, %c0_i32_0, %c0_i32_1 : i32, i32, i32, i32
  }
}

</mosaic_0001>

<bundles_post_ra>
// kernel: tpu_custom_call.1
= control target key start
LH: loop header
LB: loop body
LE: loop exit
PB: predicated region body
PF: predicated region fallthrough
CT: control target
= control target key end

     0   :  { %s2572_s0 = inlined_call_operand.hbm [shape: f32[2,4,16,16], index: 0, kind: input, shape index: {}]   ;;  %s2573_s1 = inlined_call_operand.hbm [shape: f32[2,7,16,16], index: 1, kind: input, shape index: {}]   ;;  %s2574_s2 = inlined_call_operand.<no memory space> [shape: f32[1], index: 2, kind: input, shape index: {}]   ;;  %s2575_s3 = inlined_call_operand.hbm [shape: f32[2,1,16,16], index: 3, kind: output, shape index: {}]  }
   0x1   :  { %8 = sst [smem:[#allocation4]] %s2574_s2 }
   0x2   :  { %9 = vsyncpa [#allocation6], 0 }
   0x3   :  { %11 = vsyncpa [#allocation6 + $0x1], 0 }
   0x4   :  { %12 = vsyncpa [#allocation9], 0 }
   0x5   :  { %13 = vsyncpa [#allocation7], 0 }
   0x6   :  { %15 = vsyncpa [#allocation7 + $0x1], 0  ;;  %s2216_s14 = smov 0   ;;  %s2218_s15 = smov 0  }
   0x7   :  { %s2220_s16 = smov 0   ;;  %s2222_s17 = smov 0  }
   0x8   :  { %s2224_s18 = smov 0   ;;  %s2226_s19 = smov 0  }
   0x9 LB: > { %s1660_s2 = sadd.s32 4294967295, %s2182_s19   ;;  %s1661_s20 = sadd.s32 4294967294, %s2182_s19   ;;  %s2182_s19 = sphi %s2226_s19, %s21_s19   ;;  %s2178_s18 = sphi %s2224_s18, %s2599_s18   ;;  %s2174_s17 = sphi %s2222_s17, %s2598_s17   ;;  %s2170_s16 = sphi %s2220_s16, %s2597_s16   ;;  %s2166_s15 = sphi %s2218_s15, %s2596_s15   ;;  %s2162_s14 = sphi %s2216_s14, %s2595_s14  }
   0xa   : > { %p55_p0 = scmp.ne.s32.totalorder %s2166_s15, %s2162_s14  ;;  %p2250_p1 = scmp.eq.s32.totalorder %s1660_s2, 0 }
   0xb   : > { %p2254_p2 = scmp.eq.s32.totalorder %s1660_s2, 1  ;;  %p127_p3 = scmp.eq.s32.totalorder %s1661_s20, 1 }
   0xc   : > { %s2580_s21 = scalar_select %p2250_p1, 1, 0 }
   0xd   : > { %s2581_s22 = scalar_select %p2254_p2, 1, 0 }
   0xe   : > { %p2260_p4 = por %p2250_p1, %p55_p0  ;;  %p1662_p5 = scmp.ge.s32.totalorder %s2182_s19, 1 }
   0xf   : > { %p2265_p6 = por %p127_p3, %p55_p0  ;;  %p134_p7 = scmp.lt.s32.totalorder %s2182_s19, 3 }
  0x10   : > { %s2582_s23 = scalar_select %p2260_p4, 1, 0 }
  0x11   : > { %s2583_s24 = scalar_select %p2265_p6, 1, 0 }
  0x12   : > { %p2270_p8 = pnand %p1662_p5, %p134_p7  ;;  %s2184_s26 = smov [#allocation8]  }
  0x13   : > { %s146_s27 = sshll.u32 %s2184_s26, 4  ;;  %s33_s29 = sadd.s32 1, %s2178_s18  ;;  %s147_s27 = int_to_ptr.vmem [resolvable:$true] %s146_s27 }
  0x14   : > { %s2584_s25 = scalar_select %p2270_p8, 1, 0 }
  0x15   : > { %p1959_p9 = pneg %p2270_p8  ;;  %s2038_s5 = scalar_lea.hbm %s2573_s1, 3584 }
  0x16   : > { %p2039_p12 = scmp.ne.s32.totalorder %s2573_s1, %s2038_s5  ;;  %p2045_p5 = scmp.lt.u32.totalorder %s2038_s5, %s2573_s1 }
  0x17   : > { %p2279_p11 = pnand %p1959_p9, %p2250_p1 }
  0x19   : > { %p2040_p13 = pneg %p2279_p11 }
  0x1b   : > { %p2041_p0 = pnand %p2040_p13, %p2039_p12 }
  0x1d   : > { %p2042_p3 = pneg %p2041_p0 }
  0x1f   : > { %p2047_p7 = pnand %p2045_p5, %p2042_p3 }
  0x21   : > { %2050 = shalt.err (!%p2047_p7)
}
  0x22   : > { %s2051_s10 = scalar_lea.vmem %s147_s27, 3584  ;;  %p2059_p1 = scmp.lt.s32.totalorder %s147_s27, %s147_s27 }
  0x23   : > { %p2052_p9 = scmp.ne.s32.totalorder %s147_s27, %s2051_s10  ;;  %p2060_p4 = scmp.lt.s32.totalorder %s2051_s10, %s2051_s10 }
  0x25   : > { %p2054_p10 = pnand %p2052_p9, %p2040_p13  ;;  %p2061_p8 = por %p2060_p4, %p2059_p1 }
  0x27   : > { %p2055_p6 = pneg %p2054_p10 }
  0x29   : > { %p2062_p2 = pnand %p2061_p8, %p2055_p6 }
  0x2b   : > { %2065 = shalt.err (!%p2062_p2)
}
  0x2c   : > { %s2185_s11 = smov 128   ;;  %s2186_s12 = smov 8  }
  0x2d   : > { %1962 = dma.hbm_to_vmem [thread:$0]  (!%p2279_p11), %s2573_s1, 3584, %s147_s27, [#allocation9], %s2185_s11, %s2185_s11, %s2186_s12  }
  0x2e   : > { %p35_p1 = scmp.ge.s32.totalorder %s33_s29, 2  ;;  %s42_s20 = sadd.s32 1, %s2170_s16 }
  0x2f   : > { %p49_p2 = scmp.ne.s32.totalorder %s2170_s16, %s2166_s15  ;;  %p50_p4 = scmp.eq.s32.totalorder %s2182_s19, 0 }
  0x30   : > { %s2601_s29 = smov (%p35_p1, %s33_s29), 0  ;;  %p2587_p8 = scmp.ne.s32.totalorder %s2581_s22, 0 }
  0x31   : > { %p2309_p6 = por %p50_p4, %p49_p2  ;;  %s37_s30 = ssub.s32 %s2178_s18, %s2601_s29 }
  0x32   : > { %p2315_p10 = por %p2587_p8, %p49_p2  ;;  %p1972_p12 = scmp.lt.s32.totalorder %s2182_s19, 2 }
  0x33   : > { %p40_p11 = scmp.eq.s32.totalorder %s37_s30, 0  ;;  %s163_s27 = sand.u32 1, %s2170_s16  }
  0x34   : > { %s1665_s4 = sshll.u32 %s163_s27, 6  ;;  %s1713_s6 = sshll.u32 %s2178_s18, 10 }
  0x35   : > { %s2324_s5 = scalar_select %p40_p11, %s2170_s16, %s42_s20  }
  0x36   : > { %s2330_s9 = scalar_lea.hbm %s2572_s0, %s1713_s6  ;;  %s167_s22 = scalar_lea.vmem [#allocation5], %s1665_s4 }
  0x37   : > { %s177_s10 = sshll.u32 %s167_s22, 4  ;;  %p2336_p13 = pnand %p1972_p12, %p2309_p6  ;;  %s2332_s10 = int_to_ptr.vmem [resolvable:$true] %s177_s10 }
  0x38   : > { %s2340_s2 = scalar_lea.sflag [#allocation6], %s163_s27  ;;  %s2066_s20 = scalar_lea.hbm %s2330_s9, 1024 }
  0x39   : > { %p2067_p0 = scmp.ne.s32.totalorder %s2330_s9, %s2066_s20  ;;  %p2068_p3 = pneg %p2336_p13 }
  0x3a   : > { %s2071_s26 = scalar_lea.hbm %s2572_s0, 2048  ;;  %p2072_p9 = scmp.lt.u32.totalorder %s2330_s9, %s2572_s0 }
  0x3b   : > { %p2069_p5 = pnand %p2068_p3, %p2067_p0  ;;  %p2073_p1 = scmp.lt.u32.totalorder %s2071_s26, %s2066_s20 }
  0x3c   : > { %p2075_p4 = scmp.lt.u32.totalorder %s2066_s20, %s2330_s9 }
  0x3d   : > { %p2070_p7 = pneg %p2069_p5  ;;  %p2074_p2 = por %p2073_p1, %p2072_p9 }
  0x3f   : > { %p2076_p6 = por %p2075_p4, %p2074_p2 }
  0x41   : > { %p2077_p8 = pnand %p2076_p6, %p2070_p7 }
  0x43   : > { %2080 = shalt.err (!%p2077_p8)
}
  0x44   : > { %s2081_s27 = scalar_lea.vmem %s2332_s10, 1024  ;;  %s2187_s8 = smov [#allocation5]  }
  0x45   : > { %p2082_p12 = scmp.ne.s32.totalorder %s2332_s10, %s2081_s27  ;;  %s2086_s22 = sshll.u32 %s2187_s8, 4  ;;  %s2087_s22 = int_to_ptr.vmem [resolvable:$false] %s2086_s22 }
  0x46   : > { %s2088_s30 = scalar_lea.vmem %s2087_s22, 2048  ;;  %p2089_p5 = scmp.lt.s32.totalorder %s2332_s10, %s2087_s22 }
  0x47   : > { %p2084_p11 = pnand %p2082_p12, %p2068_p3  ;;  %p2090_p9 = scmp.lt.s32.totalorder %s2088_s30, %s2081_s27 }
  0x49   : > { %p2085_p0 = pneg %p2084_p11  ;;  %p2091_p1 = por %p2090_p9, %p2089_p5 }
  0x4b   : > { %p2092_p2 = pnand %p2091_p1, %p2085_p0 }
  0x4d   : > { %2095 = shalt.err (!%p2092_p2)
}
  0x4e   : > { %1966 = dma.hbm_to_vmem [thread:$0]  (!%p2336_p13), %s2330_s9, 1024, %s2332_s10, %s2340_s2, %s2185_s11, %s2185_s11, %s2186_s12  }
  0x4f   : > { %p2590_p3 = scmp.ne.s32.totalorder %s2584_s25, 0 }
  0x50   : > { %s2374_s20 = sand.u32 (!%p2590_p3), 1, %s2166_s15   ;;  %p2591_p7 = scmp.ne.s32.totalorder (!%p2590_p3), %s2582_s23, 0 }
  0x51   : > { %189 = sbr.rel (%p2590_p3) target bundleno = 429 (0x1ad), region = 32  ;;  %s1669_s4 = sshll.u32 (!%p2590_p3), %s2374_s20, 6 }
  0x52   : > { %s192_s26 = scalar_lea.sflag (!%p2590_p3), [#allocation6], %s2374_s20  ;;  %s2378_s6 = scalar_lea.vmem (!%p2590_p3), [#allocation5], %s1669_s4 }
  0x58   : > { %2149 = dma.done.wait (%p2591_p7), %s192_s26, 1024  }
  0x59   : > { %2151 = vsyncadd (%p2591_p7), %s192_s26, 4294966272  ;;  %p2592_p13 = scmp.ne.s32.totalorder %s2580_s21, 0 }
  0x5b   : > { %2153 = dma.done.wait (%p2592_p13), [#allocation9], 3584  }
  0x5c   : > { %2155 = vsyncadd (%p2592_p13), [#allocation9], 4294963712  ;;  %vm227_vm0 = vcmask 130048   ;;  %v2188_v0 = vmov -inf   ;;  %v2189_v1 = vmov 0.0   ;;  %v302_v2 = vld [vmem:[#allocation8 + $0x10] sm:$0xff] }
  0x5d   : > { %228 = vst.msk [vmem:[#allocation2] sm:$0xff] %vm227_vm0, %v2188_v0  ;;  %229 = vst.msk [vmem:[#allocation2 + $0x8] sm:$0xff] %vm227_vm0, %v2188_v0  ;;  %v303_v3 = vld [vmem:[#allocation8 + $0x18] sm:$0xff]  ;;  %v908_v4 = vld [vmem:[#allocation8 + $0xa0] sm:$0xff]  ;;  %vm275_vm1 = vcmask 1042432   ;;  %vm306_vm2 = vcmask 1046528  }
  0x5e   : > { %230 = vst.msk [vmem:[#allocation3] sm:$0xff] %vm227_vm0, %v2189_v1  ;;  %231 = vst.msk [vmem:[#allocation3 + $0x8] sm:$0xff] %vm227_vm0, %v2189_v1  ;;  %v1869_v5 = vpack.c.bf16 %v303_v3, %v302_v2  ;;  %v909_v6 = vld [vmem:[#allocation8 + $0xa8] sm:$0xff]  ;;  %v232_v7 = vld [vmem:[%s2378_s6] sm:$0xff]  ;;  %vm820_vm3 = vcmask 1044480   ;;  %vm999_vm4 = vcmask 1043456  }
  0x5f   : > { %v233_v8 = vld [vmem:[%s2378_s6 + $0x8] sm:$0xff]  ;;  %v1897_v9 = vpack.c.bf16 %v909_v6, %v908_v4  ;;  %v1672_v10 = vld [vmem:[%s2378_s6 + $0x10] sm:$0xff]  ;;  %v1673_v11 = vld [vmem:[%s2378_s6 + $0x18] sm:$0xff]  ;;  %vm641_vm5 = vcmask 1045504   ;;  %vm1356_vm6 = vcmask 1041408   ;;  %s1534_s21 = sld [smem:[#allocation4]] }
  0x60   : > { %v1674_v12 = vld [vmem:[%s2378_s6 + $0x20] sm:$0xff]  ;;  %1870 = vmatprep.subr.bf16.mxu1 %v1869_v5  ;;  %v237_v13 = vmax.f32 %v232_v7, %v1672_v10  ;;  %v238_v14 = vmax.f32 %v233_v8, %v1673_v11  ;;  %v1675_v15 = vld [vmem:[%s2378_s6 + $0x28] sm:$0xff]  ;;  %v1676_v16 = vld [vmem:[%s2378_s6 + $0x30] sm:$0xff]  ;;  %v239_v17 = vadd.f32 %v1672_v10, %v232_v7  ;;  %v240_v18 = vadd.f32 %v1673_v11, %v233_v8  ;;  %s1671_s23 = sshll.u32 %s2374_s20, 4  ;;  %s1714_s25 = sshll.u32 %s2174_s17, 8 }
  0x61   : > { %1872 = vmatpush3.bf16.msra.mxu1 %v1869_v5  ;;  %1898 = vmatprep.subr.bf16.mxu0 %v1897_v9  ;;  %v1677_v19 = vld [vmem:[%s2378_s6 + $0x38] sm:$0xff]  ;;  %v296_v21 = vld [vmem:[#allocation8] sm:$0xff]  ;;  %v297_v25 = vld [vmem:[#allocation8 + $0x8] sm:$0xff]  ;;  %s221_s11 = scalar_lea.vmem [#allocation10], %s1671_s23  ;;  %s2519_s13 = scalar_lea.hbm %s2575_s3, %s1714_s25 }
  0x62   : > { %1900 = vmatpush3.bf16.msra.mxu0 %v1897_v9  ;;  %v244_v22 = vmax.f32 %v237_v13, %v1674_v12  ;;  %v245_v23 = vmax.f32 %v238_v14, %v1675_v15  ;;  %v246_v26 = vadd.f32 %v1674_v12, %v239_v17  ;;  %v247_v27 = vadd.f32 %v1675_v15, %v240_v18  ;;  %v997_v31 = vld [vmem:[#allocation8 + $0x40] sm:$0xff]  ;;  %v998_v32 = vld [vmem:[#allocation8 + $0x48] sm:$0xff]  ;;  %v1087_v4 = vld [vmem:[#allocation8 + $0xb0] sm:$0xff]  ;;  %s1566_s12 = sshll.u32 %s221_s11, 4  ;;  %s1553_s2 = scalar_lea.sflag [#allocation7], %s2374_s20  ;;  %s2521_s12 = int_to_ptr.vmem [resolvable:$true] %s1566_s12 }
  0x63   : > { %v1873_v29 = vpack.c.bf16 %v297_v25, %v296_v21  ;;  %v1901_v37 = vpack.c.bf16 %v998_v32, %v997_v31  ;;  %v471_v50 = vld [vmem:[#allocation8 + $0x80] sm:$0xff]  ;;  %v472_v51 = vld [vmem:[#allocation8 + $0x88] sm:$0xff]  ;;  %v1088_v5 = vld [vmem:[#allocation8 + $0xb8] sm:$0xff]  ;;  %s2096_s17 = scalar_lea.vmem %s2521_s12, 256  ;;  %s2190_s7 = smov [#allocation10]  }
  0x64   : > { %v255_v20 = vld [vmem:[#allocation2] sm:$0xff]  ;;  %v256_v24 = vld [vmem:[#allocation2 + $0x8] sm:$0xff]  ;;  %v251_v33 = vmax.f32 %v244_v22, %v1676_v16  ;;  %v252_v34 = vmax.f32 %v245_v23, %v1677_v19  ;;  %v253_v35 = vadd.f32 %v1676_v16, %v246_v26  ;;  %v254_v36 = vadd.f32 %v1677_v19, %v247_v27  ;;  %v299_v15 = vld [vmem:[#allocation8 + $0x70] sm:$0xff]  ;;  %p2097_p4 = scmp.ne.s32.totalorder %s2521_s12, %s2096_s17  ;;  %s2100_s27 = sshll.u32 %s2190_s7, 4  ;;  %s2101_s27 = int_to_ptr.vmem [resolvable:$false] %s2100_s27 }
  0x65   : > { %v262_v28 = vld [vmem:[#allocation3] sm:$0xff]  ;;  %v263_v30 = vld [vmem:[#allocation3 + $0x8] sm:$0xff]  ;;  %1874 = vmatprep.subr.bf16.mxu1 %v1873_v29  ;;  %1902 = vmatprep.subr.bf16.mxu0 %v1901_v37  ;;  %v1877_v61 = vpack.c.bf16 %v472_v51, %v471_v50  ;;  %v1905_v11 = vpack.c.bf16 %v1088_v5, %v1087_v4  ;;  %v1355_v50 = vld [vmem:[#allocation8 + $0x68] sm:$0xff]  ;;  %s2102_s8 = scalar_lea.vmem %s2101_s27, 512  ;;  %p2103_p12 = scmp.lt.s32.totalorder %s2521_s12, %s2101_s27 }
  0x66   : > { %v257_v38 = vmax.f32 %v255_v20, %v251_v33  ;;  %v258_v39 = vmax.f32 %v256_v24, %v252_v34  ;;  %v264_v40 = vadd.f32 %v262_v28, %v253_v35  ;;  %v265_v41 = vadd.f32 %v263_v30, %v254_v36  ;;  %v300_v16 = vld [vmem:[#allocation8 + $0x78] sm:$0xff]  ;;  %v1176_v22 = vld [vmem:[#allocation8 + $0x50] sm:$0xff]  ;;  %v639_v28 = vld [vmem:[#allocation8 + $0x20] sm:$0xff]  ;;  %p2098_p6 = pnand %p2097_p4, %p2315_p10  ;;  %p2104_p11 = scmp.lt.s32.totalorder %s2102_s8, %s2096_s17 }
  0x67   : > { %v1881_v21 = vpack.c.bf16 %v300_v16, %v299_v15  ;;  %v1177_v23 = vld [vmem:[#allocation8 + $0x58] sm:$0xff]  ;;  %v1265_v35 = vld [vmem:[#allocation8 + $0xc0] sm:$0xff]  ;;  %v1266_v36 = vld [vmem:[#allocation8 + $0xc8] sm:$0xff] }
  0x68   : > { %260 = vst.msk [vmem:[#allocation2] sm:$0xff] %vm227_vm0, %v257_v38  ;;  %261 = vst.msk [vmem:[#allocation2 + $0x8] sm:$0xff] %vm227_vm0, %v258_v39  ;;  %v1909_v27 = vpack.c.bf16 %v1177_v23, %v1176_v22  ;;  %v1913_v39 = vpack.c.bf16 %v1266_v36, %v1265_v35  ;;  %p2099_p8 = pneg %p2098_p6  ;;  %p2105_p0 = por %p2104_p11, %p2103_p12 }
  0x69   : > { %266 = vst.msk [vmem:[#allocation3] sm:$0xff] %vm227_vm0, %v264_v40  ;;  %267 = vst.msk [vmem:[#allocation3 + $0x8] sm:$0xff] %vm227_vm0, %v265_v41 }
  0x6a   : > { %p2106_p5 = pnand %p2105_p0, %p2099_p8 }
  0x6f   : > { %v271_v42 = vld [vmem:[#allocation2] sm:$0xff]  ;;  %v272_v43 = vld [vmem:[#allocation2 + $0x8] sm:$0xff] }
  0x70   : > { %v283_v44 = vld [vmem:[#allocation3] sm:$0xff]  ;;  %v276_v45 = vrot.slane %v271_v42, 5  ;;  %v277_v46 = vrot.slane %v272_v43, 5  ;;  %v284_v47 = vld [vmem:[#allocation3 + $0x8] sm:$0xff] }
  0x71   : > { %v285_v48 = vmul.f32 0.25, %v283_v44  ;;  %v286_v49 = vmul.f32 0.25, %v284_v47  ;;  %v729_v42 = vld [vmem:[#allocation8 + $0x90] sm:$0xff]  ;;  %v730_v43 = vld [vmem:[#allocation8 + $0x98] sm:$0xff] }
  0x72   : > { %v2405_v52 = vsel %vm275_vm1, %v276_v45, %v277_v46  ;;  %v2408_v53 = vsel %vm275_vm1, 0.0, %v276_v45  ;;  %v2411_v54 = vsel %vm275_vm1, %v277_v46, 0.0 }
  0x73   : > { %v289_v55 = vrot.slane %v285_v48, 5  ;;  %v307_v56 = vrot.slane %v2408_v53, 1  ;;  %v308_v57 = vrot.slane %v2405_v52, 1  ;;  %v310_v58 = vrot.slane %v2411_v54, 1 }
  0x74   : > { %v290_v59 = vrot.slane %v286_v49, 5  ;;  %v1000_v62 = vrot.slane %v2408_v53, 4  ;;  %v1001_v63 = vrot.slane %v2405_v52, 4  ;;  %v1003_v17 = vrot.slane %v2411_v54, 4  ;;  %v1354_v49 = vld [vmem:[#allocation8 + $0x60] sm:$0xff] }
  0x75   : > { %v2417_v60 = vsel %vm275_vm1, 0.0, %v289_v55  ;;  %v309_v0 = vsel %vm306_vm2, %v307_v56, %v308_v57  ;;  %v311_v1 = vsel %vm306_vm2, %v308_v57, %v310_v58  ;;  %v1178_v32 = vrot.slane %v2408_v53, 5 }
  0x76   : > { %v2424_v2 = vsel %vm275_vm1, %v289_v55, %v290_v59  ;;  %v910_v3 = vrot.slane %v2417_v60, 3  ;;  %1775 = vmatprep.mubr.msk.f32.mxu1 %vm227_vm0, %v309_v0  ;;  %v2430_v7 = vsel %vm275_vm1, %v290_v59, 0.0  ;;  %v1002_v10 = vsel %vm999_vm4, %v1000_v62, %v1001_v63  ;;  %v819_v62 = vld [vmem:[#allocation8 + $0x38] sm:$0xff] }
  0x77   : > { %v911_v6 = vrot.slane %v2424_v2, 3  ;;  %1776 = vmatmul.mubr.msk.f32.vlgmr.msra.gmra.mrb[0].mxu1 %vm227_vm0, %v311_v1  ;;  %v913_v8 = vrot.slane %v2430_v7, 3  ;;  %v475_v13 = vrot.slane %v2417_v60, 1  ;;  %v476_v14 = vrot.slane %v2424_v2, 1 }
  0x78   : > { %1876 = vmatpush3.bf16.msra.mxu1 %v1873_v29  ;;  %1782 = vmatprep.mubr.msk.f32.mxu1 %vm227_vm0, %v2408_v53  ;;  %v1089_v18 = vrot.slane %v2417_v60, 4  ;;  %v1090_v19 = vrot.slane %v2424_v2, 4  ;;  %v1004_v24 = vsel %vm999_vm4, %v1001_v63, %v1003_v17  ;;  %v478_v25 = vrot.slane %v2430_v7, 1  ;;  %v640_v29 = vld [vmem:[#allocation8 + $0x28] sm:$0xff] }
  0x79   : > { %v912_v9 = vsel %vm820_vm3, %v910_v3, %v911_v6  ;;  %v914_v12 = vsel %vm820_vm3, %v911_v6, %v913_v8  ;;  %1878 = vmatprep.subr.bf16.mxu1 %v1877_v61  ;;  %v477_v20 = vsel %vm306_vm2, %v475_v13, %v476_v14  ;;  %v1092_v30 = vrot.slane %v2430_v7, 4  ;;  %v1444_v6 = vld [vmem:[#allocation8 + $0xd0] sm:$0xff]  ;;  %v1445_v8 = vld [vmem:[#allocation8 + $0xd8] sm:$0xff] }
  0x7a   : > { %1824 = vmatprep.mubr.msk.f32.mxu0 %vm227_vm0, %v912_v9  ;;  %v1091_v26 = vsel %vm999_vm4, %v1089_v18, %v1090_v19  ;;  %v479_v31 = vsel %vm306_vm2, %v476_v14, %v478_v25  ;;  %v1179_v33 = vrot.slane %v2405_v52, 5  ;;  %v1885_v34 = vpack.c.bf16 %v640_v29, %v639_v28 }
  0x7b   : > { %1825 = vmatmul.mubr.msk.f32.vlgmr.msra.gmra.mrb[0].mxu0 %vm227_vm0, %v914_v12  ;;  %v642_v40 = vrot.slane %v2408_v53, 2  ;;  %v643_v41 = vrot.slane %v2405_v52, 2  ;;  %v1181_v44 = vrot.slane %v2411_v54, 5  ;;  %v1267_v45 = vrot.slane %v2417_v60, 5 }
  0x7c   : > { %1904 = vmatpush3.bf16.msra.mxu0 %v1901_v37  ;;  %1831 = vmatprep.mubr.msk.f32.mxu0 %vm227_vm0, %v1002_v10  ;;  %v1093_v37 = vsel %vm999_vm4, %v1090_v19, %v1092_v30  ;;  %v1180_v38 = vsel %vm275_vm1, %v1178_v32, %v1179_v33  ;;  %v1268_v46 = vrot.slane %v2424_v2, 5  ;;  %v1889_v48 = vpack.c.bf16 %v730_v43, %v729_v42 }
  0x7d   : > { %1906 = vmatprep.subr.bf16.mxu0 %v1905_v11  ;;  %v644_v47 = vsel %vm641_vm5, %v642_v40, %v643_v41  ;;  %v1182_v51 = vsel %vm275_vm1, %v1179_v33, %v1181_v44  ;;  %v645_v55 = vrot.slane %v2411_v54, 2  ;;  %v1917_v57 = vpack.c.bf16 %v1355_v50, %v1354_v49 }
  0x7e   : > { %v1269_v56 = vsel %vm275_vm1, %v1267_v45, %v1268_v46  ;;  %v731_v58 = vrot.slane %v2417_v60, 2  ;;  %v732_v59 = vrot.slane %v2424_v2, 2  ;;  %v1270_v63 = vrot.slane %v2430_v7, 5 }
  0x7f   : > { %1783 = vmatmul.mubr.msk.f32.vlgmr.msra.gmra.mrb[0].mxu1 %vm227_vm0, %v2405_v52  ;;  %v646_v0 = vsel %vm641_vm5, %v643_v41, %v645_v55  ;;  %v1357_v1 = vrot.slane %v2408_v53, 6  ;;  %v1358_v3 = vrot.slane %v2405_v52, 6  ;;  %v734_v10 = vrot.slane %v2430_v7, 2 }
  0x80   : > { %1880 = vmatpush3.bf16.msra.mxu1 %v1877_v61  ;;  %1789 = vmatprep.mubr.msk.f32.mxu1 %vm227_vm0, %v477_v20  ;;  %v818_v61 = vld [vmem:[#allocation8 + $0x30] sm:$0xff]  ;;  %v733_v4 = vsel %vm641_vm5, %v731_v58, %v732_v59  ;;  %v1271_v9 = vsel %vm275_vm1, %v1268_v46, %v1270_v63  ;;  %v1921_v12 = vpack.c.bf16 %v1445_v8, %v1444_v6  ;;  %v821_v13 = vrot.slane %v2408_v53, 3 }
  0x81   : > { %1882 = vmatprep.subr.bf16.mxu1 %v1881_v21  ;;  %v1893_v5 = vpack.c.bf16 %v819_v62, %v818_v61  ;;  %v822_v14 = vrot.slane %v2405_v52, 3  ;;  %v1360_v15 = vrot.slane %v2411_v54, 6  ;;  %v735_v16 = vsel %vm641_vm5, %v732_v59, %v734_v10 }
  0x82   : > { %v1446_v17 = vrot.slane %v2417_v60, 6  ;;  %v1447_v18 = vrot.slane %v2424_v2, 6  ;;  %v824_v53 = vrot.slane %v2411_v54, 3 }
  0x83   : > { %1832 = vmatmul.mubr.msk.f32.vlgmr.msra.gmra.mrb[0].mxu0 %vm227_vm0, %v1004_v24  ;;  %v823_v19 = vsel %vm820_vm3, %v821_v13, %v822_v14  ;;  %v1361_v52 = vsel %vm1356_vm6, %v1358_v3, %v1360_v15  ;;  %v1535_v24 = vstv %s1534_s21 }
  0x84   : > { %1908 = vmatpush3.bf16.msra.mxu0 %v1905_v11  ;;  %1838 = vmatprep.mubr.msk.f32.mxu0 %vm227_vm0, %v1091_v26  ;;  %v1359_v11 = vsel %vm1356_vm6, %v1357_v1, %v1358_v3  ;;  %v1448_v20 = vsel %vm1356_vm6, %v1446_v17, %v1447_v18 }
  0x85   : > { %1910 = vmatprep.subr.bf16.mxu0 %v1909_v27 }
  0x87   : > { %1790 = vmatmul.mubr.msk.f32.vlgmr.msra.gmra.mrb[0].mxu1 %vm227_vm0, %v479_v31 }
  0x88   : > { %1884 = vmatpush3.bf16.msra.mxu1 %v1881_v21  ;;  %1796 = vmatprep.mubr.msk.f32.mxu1 %vm227_vm0, %v2417_v60  ;;  %v1449_v60 = vrot.slane %v2430_v7, 6 }
  0x89   : > { %1886 = vmatprep.subr.bf16.mxu1 %v1885_v34 }
  0x8a   : > { %v1450_v21 = vsel %vm1356_vm6, %v1447_v18, %v1449_v60 }
  0x8b   : > { %1839 = vmatmul.mubr.msk.f32.vlgmr.msra.gmra.mrb[0].mxu0 %vm227_vm0, %v1093_v37 }
  0x8c   : > { %1912 = vmatpush3.bf16.msra.mxu0 %v1909_v27  ;;  %1845 = vmatprep.mubr.msk.f32.mxu0 %vm227_vm0, %v1180_v38 }
  0x8d   : > { %1914 = vmatprep.subr.bf16.mxu0 %v1913_v39 }
  0x8f   : > { %1797 = vmatmul.mubr.msk.f32.vlgmr.msra.gmra.mrb[0].mxu1 %vm227_vm0, %v2424_v2  ;;  %v825_v2 = vsel %vm820_vm3, %v822_v14, %v824_v53 }
  0x90   : > { %1888 = vmatpush3.bf16.msra.mxu1 %v1885_v34  ;;  %1803 = vmatprep.mubr.msk.f32.mxu1 %vm227_vm0, %v644_v47 }
  0x91   : > { %1890 = vmatprep.subr.bf16.mxu1 %v1889_v48 }
  0x93   : > { %1846 = vmatmul.mubr.msk.f32.vlgmr.msra.gmra.mrb[0].mxu0 %vm227_vm0, %v1182_v51 }
  0x94   : > { %1916 = vmatpush3.bf16.msra.mxu0 %v1913_v39  ;;  %1852 = vmatprep.mubr.msk.f32.mxu0 %vm227_vm0, %v1269_v56 }
  0x95   : > { %1918 = vmatprep.subr.bf16.mxu0 %v1917_v57 }
  0x97   : > { %1804 = vmatmul.mubr.msk.f32.vlgmr.msra.gmra.mrb[0].mxu1 %vm227_vm0, %v646_v0 }
  0x98   : > { %1892 = vmatpush3.bf16.msra.mxu1 %v1889_v48  ;;  %1810 = vmatprep.mubr.msk.f32.mxu1 %vm227_vm0, %v733_v4 }
  0x99   : > { %1894 = vmatprep.subr.bf16.mxu1 %v1893_v5 }
  0x9b   : > { %1853 = vmatmul.mubr.msk.f32.vlgmr.msra.gmra.mrb[0].mxu0 %vm227_vm0, %v1271_v9 }
  0x9c   : > { %1920 = vmatpush3.bf16.msra.mxu0 %v1917_v57  ;;  %1859 = vmatprep.mubr.msk.f32.mxu0 %vm227_vm0, %v1359_v11 }
  0x9d   : > { %1922 = vmatprep.subr.bf16.mxu0 %v1921_v12 }
  0x9f   : > { %1811 = vmatmul.mubr.msk.f32.vlgmr.msra.gmra.mrb[0].mxu1 %vm227_vm0, %v735_v16 }
  0xa0   : > { %1896 = vmatpush3.bf16.msra.mxu1 %v1893_v5  ;;  %1817 = vmatprep.mubr.msk.f32.mxu1 %vm227_vm0, %v823_v19 }
  0xa3   : > { %1860 = vmatmul.mubr.msk.f32.vlgmr.msra.gmra.mrb[0].mxu0 %vm227_vm0, %v1361_v52 }
  0xa4   : > { %1924 = vmatpush3.bf16.msra.mxu0 %v1921_v12  ;;  %1866 = vmatprep.mubr.msk.f32.mxu0 %vm227_vm0, %v1448_v20 }
  0xa7   : > { %1818 = vmatmul.mubr.msk.f32.vlgmr.msra.gmra.mrb[0].mxu1 %vm227_vm0, %v825_v2 }
  0xab   : > { %1867 = vmatmul.mubr.msk.f32.vlgmr.msra.gmra.mrb[0].mxu0 %vm227_vm0, %v1450_v21 }
 0x17a   : > { %v1819_v22 = vpop.f32.mrb[0].mxu1 }
 0x17b   : > { %v896_v54 = vpop.f32.mrb[1].mxu1 }
 0x17e   : > { %v1868_v23 = vpop.f32.mrb[0].mxu0 }
 0x17f   : > { %v1925_v25 = vadd.f32 %v1868_v23, %v1819_v22  ;;  %v1521_v26 = vpop.f32.mrb[1].mxu0 }
 0x180   : > { %v1926_v27 = vadd.f32 %v1521_v26, %v896_v54 }
 0x181   : > { %v1537_v28 = vadd.f32 %v1925_v25, %v1535_v24 }
 0x182   : > { %v1536_v7 = vadd.f32 %v1926_v27, %v1535_v24 }
 0x183   : > { %v1707_v29 = vmul.f32 -1.442695, %v1537_v28 }
 0x184   : > { %v1706_v30 = vmul.f32 -1.442695, %v1536_v7 }
 0x185   : > { %2030 = vpow2.f32 %v1707_v29 }
 0x186   : > { %2032 = vpow2.f32 %v1706_v30 }
 0x18f   : > { %v2031_v31 = vpop.eup %2030 }
 0x190   : > { %v2033_v32 = vpop.eup %2032  ;;  %v1545_v33 = vadd.f32 1.0, %v2031_v31 }
 0x191   : > { %v1544_v34 = vadd.f32 1.0, %v2033_v32 }
 0x192   : > { %2034 = vrcp.f32 %v1545_v33 }
 0x193   : > { %2036 = vrcp.f32 %v1544_v34 }
 0x19c   : > { %v2035_v35 = vpop.eup %2034 }
 0x19d   : > { %v2037_v36 = vpop.eup %2036  ;;  %1551 = vst.msk [vmem:[%s221_s11 + $0x8] sm:$0xff] %vm227_vm0, %v2035_v35 }
 0x19e   : > { %1550 = vst.msk [vmem:[%s221_s11] sm:$0xff] %vm227_vm0, %v2037_v36 }
 0x19f   : > { %2109 = shalt.err (!%p2106_p5)
}
 0x1a0   : > { %s2110_s22 = scalar_lea.hbm %s2519_s13, 256  ;;  %s2114_s26 = scalar_lea.hbm %s2575_s3, 512 }
 0x1a1   : > { %p2111_p9 = scmp.ne.s32.totalorder %s2519_s13, %s2110_s22  ;;  %p2115_p3 = scmp.lt.u32.totalorder %s2519_s13, %s2575_s3 }
 0x1a2   : > { %p2116_p7 = scmp.lt.u32.totalorder %s2114_s26, %s2110_s22  ;;  %p2118_p4 = scmp.lt.u32.totalorder %s2110_s22, %s2519_s13 }
 0x1a3   : > { %p2112_p1 = pnand %p2111_p9, %p2315_p10 }
 0x1a4   : > { %p2117_p13 = por %p2116_p7, %p2115_p3 }
 0x1a5   : > { %p2113_p2 = pneg %p2112_p1 }
 0x1a6   : > { %p2119_p6 = por %p2118_p4, %p2117_p13 }
 0x1a8   : > { %p2120_p8 = pnand %p2119_p6, %p2113_p2 }
 0x1aa   : > { %2123 = shalt.err (!%p2120_p8)
}
 0x1ab   : > { %s2191_s23 = smov 128   ;;  %s2192_s25 = smov 8  }
 0x1ac   : > { %1957 = dma.vmem_to_hbm [thread:$0]  (%p2315_p10), %s2521_s12, 256, %s2519_s13, %s1553_s2, %s2191_s23, %s2191_s23, %s2192_s25  }
 0x1ad PF: > { %s1581_s11 = sand.u32 1, %s2162_s14   ;;  %p2593_p12 = scmp.ne.s32.totalorder %s2583_s24, 0 }
 0x1ae   : > { %p2594_p11 = scmp.ge.s32.totalorder %s2182_s19, 2  ;;  %s1582_s9 = scalar_lea.sflag [#allocation7], %s1581_s11 }
 0x1b0   : > { %p1968_p0 = pnand %p2594_p11, %p2593_p12 }
 0x1b2   : > { %2157 = dma.done.wait (!%p1968_p0), %s1582_s9, 256  }
 0x1b3   : > { %2159 = vsyncadd (!%p1968_p0), %s1582_s9, 4294967040  ;;  %s21_s19 = sadd.s32 1, %s2182_s19   ;;  %s2595_s14 = smov %s2166_s15 }
 0x1b4   : > { %p18_p5 = scmp.ge.s32.totalorder %s21_s19, 4   ;;  %s2596_s15 = smov %s2170_s16 }
 0x1b5   : > { %s2597_s16 = smov %s2324_s5  ;;  %s2598_s17 = smov %s2178_s18 }
 0x1b6   : > { %s2599_s18 = smov %s2601_s29  ;;  %20 = sbr.rel (!%p18_p5) target bundleno = 9 (0x9), region = 105 }
 0x1bd   :  { %1587 = vsyncpa [#allocation6], 1 }
 0x1be   :  { %1589 = vsyncpa [#allocation6 + $0x1], 1 }
 0x1bf   :  { %1590 = vsyncpa [#allocation9], 1 }
 0x1c0   :  { %1591 = vsyncpa [#allocation7], 1 }
 0x1c1   :  { %1593 = vsyncpa [#allocation7 + $0x1], 1 }

</bundles_post_ra>
